<compile_context>
chip_gen: v7x
topology: tpu7x:2x2x1
jax: 0.10.0
libtpu: 0.0.40
codegen_flags: <defaults>
</compile_context>

<pallas_src>
import functools

import jax
import jax.numpy as jnp
from jax import lax
from jax.experimental import pallas as pl
from jax.experimental.pallas import tpu as pltpu

_LANES = 128
_SUB_ROWS = 32         # rows per register-resident sub-slab (multiple of 16 -> bf16-safe)
_MAX_TILE_ROWS = 2048  # rows per grid tile; 3*2048*128*4B ~ 3.1 MiB per f32 buffer


def _round_up(x, m):
    return (x + m - 1) // m * m


def _cdiv(a, b):
    return -(-a // b)


def _printability_kernel(img_ref, colors_ref, out_ref, *,
                         num_colors, num_sub, sub_rows, tail_off, tail_rows):
    """img_ref: (C, tile_r, 128) VMEM compute-dtype; colors_ref: (N, C, 1, 128) resident;
    out_ref: (8, 128) VMEM f32 — per-tile partial sums (reduced in the wrapper)."""

    def min_abs_sum(off, nrows):
        slab = img_ref[:, pl.ds(off, nrows), :]              # (C, nrows, 128), register-resident
        # Running min over colors stays in vregs; color_n broadcasts along sublanes.
        m = jnp.abs(slab - colors_ref[0])
        for n in range(1, num_colors):
            m = jnp.minimum(m, jnp.abs(slab - colors_ref[n]))
        csum = jnp.sum(m, axis=0, dtype=jnp.float32)          # (nrows, 128) f32: C-1 cheap adds
        part = csum[0:8, :]
        for k in range(1, nrows // 8):                        # fold rows into an (8,128) block
            part = part + csum[k * 8:(k + 1) * 8, :]
        return part

    acc = jnp.zeros((8, _LANES), jnp.float32)
    if num_sub > 0:
        def body(j, a):
            off = pl.multiple_of(j * sub_rows, sub_rows)
            return a + min_abs_sum(off, sub_rows)
        acc = lax.fori_loop(0, num_sub, body, acc, unroll=2)
    if tail_rows > 0:                                         # static epilogue (8/16/24 rows)
        acc = acc + min_abs_sum(tail_off, tail_rows)
    out_ref[...] = acc


@functools.partial(jax.jit, static_argnames=("compute_dtype",))
def _printability_score_impl(image, palette, compute_dtype):
    b, c, h, w = image.shape
    if b != 1:
        raise ValueError("PrintabilityModule.forward assumes batch == 1 (it squeezes it).")
    n = palette.shape[0]
    pal = palette.astype(jnp.float32)
    pad_val = pal[0]                                          # (C,): pad pixels contribute exactly 0

    is_bf16 = jnp.dtype(compute_dtype) == jnp.dtype(jnp.bfloat16)
    row_align = 16 if is_bf16 else 8                          # packed bf16 needs 16-row sublane tiles

    # --- repack the image into a lane/sublane-dense (C, rows, 128) slab -----------------
    hw = h * w
    hw_pad = _round_up(hw, _LANES)
    img2d = image.reshape(c, hw).astype(jnp.float32)
    if hw_pad > hw:
        img2d = jnp.concatenate(
            [img2d, jnp.broadcast_to(pad_val[:, None], (c, hw_pad - hw))], axis=1)

    rows = hw_pad // _LANES
    rows_al = _round_up(rows, row_align)

    # --- choose tiling: big tiles to amortize grid overhead, >=2 (even) tiles for v7x ---
    num_tiles = _cdiv(rows_al, _MAX_TILE_ROWS)
    if rows_al >= 2 * row_align:
        num_tiles = max(num_tiles, 2)
        num_tiles += num_tiles % 2                            # even count balances 2 TensorCores
    tile_r = _round_up(_cdiv(rows_al, num_tiles), row_align)
    rows_pad = num_tiles * tile_r

    img3 = img2d.reshape(c, rows, _LANES)
    if rows_pad > rows:
        img3 = jnp.concatenate(
            [img3, jnp.broadcast_to(pad_val[:, None, None], (c, rows_pad - rows, _LANES))],
            axis=1)

    img3 = img3.astype(compute_dtype)
    colors = jnp.broadcast_to(pal[:, :, None, None], (n, c, 1, _LANES)).astype(compute_dtype)

    num_sub = tile_r // _SUB_ROWS
    tail_rows = tile_r - num_sub * _SUB_ROWS                  # 0/8/16/24 (f32), 0/16 (bf16)
    tail_off = num_sub * _SUB_ROWS

    partials = pl.pallas_call(
        functools.partial(_printability_kernel, num_colors=n, num_sub=num_sub,
                          sub_rows=_SUB_ROWS, tail_off=tail_off, tail_rows=tail_rows),
        out_shape=jax.ShapeDtypeStruct((num_tiles * 8, _LANES), jnp.float32),
        grid=(num_tiles,),
        in_specs=[
            pl.BlockSpec((c, tile_r, _LANES), lambda i: (0, i, 0)),     # image tile
            pl.BlockSpec((n, c, 1, _LANES), lambda i: (0, 0, 0, 0)),    # palette, resident
        ],
        out_specs=pl.BlockSpec((8, _LANES), lambda i: (i, 0)),          # per-tile partials
        compiler_params=pltpu.CompilerParams(dimension_semantics=("parallel",)),
    )(img3, colors)

    return jnp.sum(partials)


def _default_compute_dtype():
    """bf16 compute on bf16-native VALU chips (v6e / v7x); f32 everywhere else."""
    try:
        kind = jax.devices()[0].device_kind.lower()
    except Exception:
        return jnp.float32
    if any(tag in kind for tag in ("v6", "v7", "7x")):
        return jnp.bfloat16
    return jnp.float32


def printability_score(image, palette, compute_dtype=None):
    """image: (1, C, H, W) float (NCHW, batch 1); palette: (N, C) float in [0, 1]."""
    if compute_dtype is None:
        compute_dtype = _default_compute_dtype()
    return _printability_score_impl(image, palette, compute_dtype=compute_dtype)


def printability_score_ref(image, palette):
    """Pure-JAX reference mirroring the PyTorch forward exactly."""
    _, c, h, w = image.shape
    colors = jnp.broadcast_to(
        palette.astype(jnp.float32)[:, :, None, None], (palette.shape[0], c, h, w))
    delta = image.astype(jnp.float32)[None] - colors[:, None]   # (N, 1, C, H, W)
    delta = jnp.squeeze(delta, axis=1)                           # (N, C, H, W)
    return jnp.sum(jnp.min(jnp.abs(delta), axis=0))


if __name__ == "__main__":
    key = jax.random.PRNGKey(0)
    k_img, k_col, k_img2 = jax.random.split(key, 3)

    num_colors = 30
    # Deterministic synthetic "printable colors" (stand-in for np.loadtxt): values in
    # [0, 255] then normalized by 255, exactly as get_colors does.
    palette_255 = jax.random.uniform(
        k_col, (num_colors, 3), minval=0.0, maxval=255.0, dtype=jnp.float32)
    palette = palette_255 / 255.0

    auto_dtype = _default_compute_dtype()
    tight_tol = dict(rtol=1e-5, atol=1e-4)
    auto_tol = (dict(rtol=5e-2, atol=5e-2)
                if jnp.dtype(auto_dtype) == jnp.dtype(jnp.bfloat16) else tight_tol)

    def check(image, dtype, tol):
        got = jax.block_until_ready(printability_score(image, palette, compute_dtype=dtype))
        want = jax.block_until_ready(printability_score_ref(image, palette))
        assert jnp.allclose(got, want, **tol), (dtype, got, want)

    # Tiny default problem (exercises the single-tile tail-only path).
    image_small = jax.random.uniform(k_img, (1, 3, 16, 16), dtype=jnp.float32)
    check(image_small, jnp.float32, tight_tol)          # exact-precision path
    check(image_small, auto_dtype, auto_tol)            # chip-default path (bf16 on v6e/v7x)

    # Mid-size problem (exercises multi-tile grid, fori main loop + tail, row padding).
    image_mid = jax.random.uniform(k_img2, (1, 3, 100, 100), dtype=jnp.float32)
    check(image_mid, jnp.float32, tight_tol)
    check(image_mid, auto_dtype, auto_tol)

    print("KERNEL_OK")
</pallas_src>

<mosaic_0001>
module attributes {stable_mosaic.version = 11 : i64} {
  func.func @_printability_kernel(%arg0: i32, %arg1: memref<3x8x128xf32, #tpu.memory_space<vmem>>, %arg2: memref<30x3x1x128xf32, #tpu.memory_space<vmem>>, %arg3: memref<8x128xf32, #tpu.memory_space<vmem>>) attributes {dimension_semantics = [#tpu.dimension_semantics<parallel>], iteration_bounds = array<i64: 1>, scalar_prefetch = 0 : i64, scratch_operands = 0 : i64, tpu.core_type = #tpu.core_type<tc>, window_params = [{transform_indices = @transform_0, window_bounds = array<i64: 3, 8, 128>}, {pipeline_mode = #tpu.pipeline_mode<synchronous>, transform_indices = @transform_1, window_bounds = array<i64: 30, 3, 1, 128>}, {transform_indices = @transform_2, window_bounds = array<i64: 8, 128>}]} {
    %cst = arith.constant 0.000000e+00 : f32
    %0 = vector.broadcast %cst : f32 to vector<8x128xf32>
    %c0 = arith.constant 0 : index
    %c0_0 = arith.constant 0 : index
    %c0_1 = arith.constant 0 : index
    %1 = vector.load %arg1[%c0, %c0_0, %c0_1] : memref<3x8x128xf32, #tpu.memory_space<vmem>>, vector<3x8x128xf32>
    %c0_2 = arith.constant 0 : index
    %c0_3 = arith.constant 0 : index
    %c0_4 = arith.constant 0 : index
    %c0_5 = arith.constant 0 : index
    %2 = vector.load %arg2[%c0_2, %c0_3, %c0_4, %c0_5] : memref<30x3x1x128xf32, #tpu.memory_space<vmem>>, vector<1x3x1x128xf32>
    %3 = vector.shape_cast %2 : vector<1x3x1x128xf32> to vector<3x1x128xf32>
    %4 = vector.broadcast %3 : vector<3x1x128xf32> to vector<3x8x128xf32>
    %5 = arith.subf %1, %4 : vector<3x8x128xf32>
    %6 = math.absf %5 : vector<3x8x128xf32>
    %c1 = arith.constant 1 : index
    %c0_6 = arith.constant 0 : index
    %c0_7 = arith.constant 0 : index
    %c0_8 = arith.constant 0 : index
    %7 = vector.load %arg2[%c1, %c0_6, %c0_7, %c0_8] : memref<30x3x1x128xf32, #tpu.memory_space<vmem>>, vector<1x3x1x128xf32>
    %8 = vector.shape_cast %7 : vector<1x3x1x128xf32> to vector<3x1x128xf32>
    %9 = vector.broadcast %8 : vector<3x1x128xf32> to vector<3x8x128xf32>
    %10 = arith.subf %1, %9 : vector<3x8x128xf32>
    %11 = math.absf %10 : vector<3x8x128xf32>
    %12 = arith.minimumf %6, %11 : vector<3x8x128xf32>
    %c2 = arith.constant 2 : index
    %c0_9 = arith.constant 0 : index
    %c0_10 = arith.constant 0 : index
    %c0_11 = arith.constant 0 : index
    %13 = vector.load %arg2[%c2, %c0_9, %c0_10, %c0_11] : memref<30x3x1x128xf32, #tpu.memory_space<vmem>>, vector<1x3x1x128xf32>
    %14 = vector.shape_cast %13 : vector<1x3x1x128xf32> to vector<3x1x128xf32>
    %15 = vector.broadcast %14 : vector<3x1x128xf32> to vector<3x8x128xf32>
    %16 = arith.subf %1, %15 : vector<3x8x128xf32>
    %17 = math.absf %16 : vector<3x8x128xf32>
    %18 = arith.minimumf %12, %17 : vector<3x8x128xf32>
    %c3 = arith.constant 3 : index
    %c0_12 = arith.constant 0 : index
    %c0_13 = arith.constant 0 : index
    %c0_14 = arith.constant 0 : index
    %19 = vector.load %arg2[%c3, %c0_12, %c0_13, %c0_14] : memref<30x3x1x128xf32, #tpu.memory_space<vmem>>, vector<1x3x1x128xf32>
    %20 = vector.shape_cast %19 : vector<1x3x1x128xf32> to vector<3x1x128xf32>
    %21 = vector.broadcast %20 : vector<3x1x128xf32> to vector<3x8x128xf32>
    %22 = arith.subf %1, %21 : vector<3x8x128xf32>
    %23 = math.absf %22 : vector<3x8x128xf32>
    %24 = arith.minimumf %18, %23 : vector<3x8x128xf32>
    %c4 = arith.constant 4 : index
    %c0_15 = arith.constant 0 : index
    %c0_16 = arith.constant 0 : index
    %c0_17 = arith.constant 0 : index
    %25 = vector.load %arg2[%c4, %c0_15, %c0_16, %c0_17] : memref<30x3x1x128xf32, #tpu.memory_space<vmem>>, vector<1x3x1x128xf32>
    %26 = vector.shape_cast %25 : vector<1x3x1x128xf32> to vector<3x1x128xf32>
    %27 = vector.broadcast %26 : vector<3x1x128xf32> to vector<3x8x128xf32>
    %28 = arith.subf %1, %27 : vector<3x8x128xf32>
    %29 = math.absf %28 : vector<3x8x128xf32>
    %30 = arith.minimumf %24, %29 : vector<3x8x128xf32>
    %c5 = arith.constant 5 : index
    %c0_18 = arith.constant 0 : index
    %c0_19 = arith.constant 0 : index
    %c0_20 = arith.constant 0 : index
    %31 = vector.load %arg2[%c5, %c0_18, %c0_19, %c0_20] : memref<30x3x1x128xf32, #tpu.memory_space<vmem>>, vector<1x3x1x128xf32>
    %32 = vector.shape_cast %31 : vector<1x3x1x128xf32> to vector<3x1x128xf32>
    %33 = vector.broadcast %32 : vector<3x1x128xf32> to vector<3x8x128xf32>
    %34 = arith.subf %1, %33 : vector<3x8x128xf32>
    %35 = math.absf %34 : vector<3x8x128xf32>
    %36 = arith.minimumf %30, %35 : vector<3x8x128xf32>
    %c6 = arith.constant 6 : index
    %c0_21 = arith.constant 0 : index
    %c0_22 = arith.constant 0 : index
    %c0_23 = arith.constant 0 : index
    %37 = vector.load %arg2[%c6, %c0_21, %c0_22, %c0_23] : memref<30x3x1x128xf32, #tpu.memory_space<vmem>>, vector<1x3x1x128xf32>
    %38 = vector.shape_cast %37 : vector<1x3x1x128xf32> to vector<3x1x128xf32>
    %39 = vector.broadcast %38 : vector<3x1x128xf32> to vector<3x8x128xf32>
    %40 = arith.subf %1, %39 : vector<3x8x128xf32>
    %41 = math.absf %40 : vector<3x8x128xf32>
    %42 = arith.minimumf %36, %41 : vector<3x8x128xf32>
    %c7 = arith.constant 7 : index
    %c0_24 = arith.constant 0 : index
    %c0_25 = arith.constant 0 : index
    %c0_26 = arith.constant 0 : index
    %43 = vector.load %arg2[%c7, %c0_24, %c0_25, %c0_26] : memref<30x3x1x128xf32, #tpu.memory_space<vmem>>, vector<1x3x1x128xf32>
    %44 = vector.shape_cast %43 : vector<1x3x1x128xf32> to vector<3x1x128xf32>
    %45 = vector.broadcast %44 : vector<3x1x128xf32> to vector<3x8x128xf32>
    %46 = arith.subf %1, %45 : vector<3x8x128xf32>
    %47 = math.absf %46 : vector<3x8x128xf32>
    %48 = arith.minimumf %42, %47 : vector<3x8x128xf32>
    %c8 = arith.constant 8 : index
    %c0_27 = arith.constant 0 : index
    %c0_28 = arith.constant 0 : index
    %c0_29 = arith.constant 0 : index
    %49 = vector.load %arg2[%c8, %c0_27, %c0_28, %c0_29] : memref<30x3x1x128xf32, #tpu.memory_space<vmem>>, vector<1x3x1x128xf32>
    %50 = vector.shape_cast %49 : vector<1x3x1x128xf32> to vector<3x1x128xf32>
    %51 = vector.broadcast %50 : vector<3x1x128xf32> to vector<3x8x128xf32>
    %52 = arith.subf %1, %51 : vector<3x8x128xf32>
    %53 = math.absf %52 : vector<3x8x128xf32>
    %54 = arith.minimumf %48, %53 : vector<3x8x128xf32>
    %c9 = arith.constant 9 : index
    %c0_30 = arith.constant 0 : index
    %c0_31 = arith.constant 0 : index
    %c0_32 = arith.constant 0 : index
    %55 = vector.load %arg2[%c9, %c0_30, %c0_31, %c0_32] : memref<30x3x1x128xf32, #tpu.memory_space<vmem>>, vector<1x3x1x128xf32>
    %56 = vector.shape_cast %55 : vector<1x3x1x128xf32> to vector<3x1x128xf32>
    %57 = vector.broadcast %56 : vector<3x1x128xf32> to vector<3x8x128xf32>
    %58 = arith.subf %1, %57 : vector<3x8x128xf32>
    %59 = math.absf %58 : vector<3x8x128xf32>
    %60 = arith.minimumf %54, %59 : vector<3x8x128xf32>
    %c10 = arith.constant 10 : index
    %c0_33 = arith.constant 0 : index
    %c0_34 = arith.constant 0 : index
    %c0_35 = arith.constant 0 : index
    %61 = vector.load %arg2[%c10, %c0_33, %c0_34, %c0_35] : memref<30x3x1x128xf32, #tpu.memory_space<vmem>>, vector<1x3x1x128xf32>
    %62 = vector.shape_cast %61 : vector<1x3x1x128xf32> to vector<3x1x128xf32>
    %63 = vector.broadcast %62 : vector<3x1x128xf32> to vector<3x8x128xf32>
    %64 = arith.subf %1, %63 : vector<3x8x128xf32>
    %65 = math.absf %64 : vector<3x8x128xf32>
    %66 = arith.minimumf %60, %65 : vector<3x8x128xf32>
    %c11 = arith.constant 11 : index
    %c0_36 = arith.constant 0 : index
    %c0_37 = arith.constant 0 : index
    %c0_38 = arith.constant 0 : index
    %67 = vector.load %arg2[%c11, %c0_36, %c0_37, %c0_38] : memref<30x3x1x128xf32, #tpu.memory_space<vmem>>, vector<1x3x1x128xf32>
    %68 = vector.shape_cast %67 : vector<1x3x1x128xf32> to vector<3x1x128xf32>
    %69 = vector.broadcast %68 : vector<3x1x128xf32> to vector<3x8x128xf32>
    %70 = arith.subf %1, %69 : vector<3x8x128xf32>
    %71 = math.absf %70 : vector<3x8x128xf32>
    %72 = arith.minimumf %66, %71 : vector<3x8x128xf32>
    %c12 = arith.constant 12 : index
    %c0_39 = arith.constant 0 : index
    %c0_40 = arith.constant 0 : index
    %c0_41 = arith.constant 0 : index
    %73 = vector.load %arg2[%c12, %c0_39, %c0_40, %c0_41] : memref<30x3x1x128xf32, #tpu.memory_space<vmem>>, vector<1x3x1x128xf32>
    %74 = vector.shape_cast %73 : vector<1x3x1x128xf32> to vector<3x1x128xf32>
    %75 = vector.broadcast %74 : vector<3x1x128xf32> to vector<3x8x128xf32>
    %76 = arith.subf %1, %75 : vector<3x8x128xf32>
    %77 = math.absf %76 : vector<3x8x128xf32>
    %78 = arith.minimumf %72, %77 : vector<3x8x128xf32>
    %c13 = arith.constant 13 : index
    %c0_42 = arith.constant 0 : index
    %c0_43 = arith.constant 0 : index
    %c0_44 = arith.constant 0 : index
    %79 = vector.load %arg2[%c13, %c0_42, %c0_43, %c0_44] : memref<30x3x1x128xf32, #tpu.memory_space<vmem>>, vector<1x3x1x128xf32>
    %80 = vector.shape_cast %79 : vector<1x3x1x128xf32> to vector<3x1x128xf32>
    %81 = vector.broadcast %80 : vector<3x1x128xf32> to vector<3x8x128xf32>
    %82 = arith.subf %1, %81 : vector<3x8x128xf32>
    %83 = math.absf %82 : vector<3x8x128xf32>
    %84 = arith.minimumf %78, %83 : vector<3x8x128xf32>
    %c14 = arith.constant 14 : index
    %c0_45 = arith.constant 0 : index
    %c0_46 = arith.constant 0 : index
    %c0_47 = arith.constant 0 : index
    %85 = vector.load %arg2[%c14, %c0_45, %c0_46, %c0_47] : memref<30x3x1x128xf32, #tpu.memory_space<vmem>>, vector<1x3x1x128xf32>
    %86 = vector.shape_cast %85 : vector<1x3x1x128xf32> to vector<3x1x128xf32>
    %87 = vector.broadcast %86 : vector<3x1x128xf32> to vector<3x8x128xf32>
    %88 = arith.subf %1, %87 : vector<3x8x128xf32>
    %89 = math.absf %88 : vector<3x8x128xf32>
    %90 = arith.minimumf %84, %89 : vector<3x8x128xf32>
    %c15 = arith.constant 15 : index
    %c0_48 = arith.constant 0 : index
    %c0_49 = arith.constant 0 : index
    %c0_50 = arith.constant 0 : index
    %91 = vector.load %arg2[%c15, %c0_48, %c0_49, %c0_50] : memref<30x3x1x128xf32, #tpu.memory_space<vmem>>, vector<1x3x1x128xf32>
    %92 = vector.shape_cast %91 : vector<1x3x1x128xf32> to vector<3x1x128xf32>
    %93 = vector.broadcast %92 : vector<3x1x128xf32> to vector<3x8x128xf32>
    %94 = arith.subf %1, %93 : vector<3x8x128xf32>
    %95 = math.absf %94 : vector<3x8x128xf32>
    %96 = arith.minimumf %90, %95 : vector<3x8x128xf32>
    %c16 = arith.constant 16 : index
    %c0_51 = arith.constant 0 : index
    %c0_52 = arith.constant 0 : index
    %c0_53 = arith.constant 0 : index
    %97 = vector.load %arg2[%c16, %c0_51, %c0_52, %c0_53] : memref<30x3x1x128xf32, #tpu.memory_space<vmem>>, vector<1x3x1x128xf32>
    %98 = vector.shape_cast %97 : vector<1x3x1x128xf32> to vector<3x1x128xf32>
    %99 = vector.broadcast %98 : vector<3x1x128xf32> to vector<3x8x128xf32>
    %100 = arith.subf %1, %99 : vector<3x8x128xf32>
    %101 = math.absf %100 : vector<3x8x128xf32>
    %102 = arith.minimumf %96, %101 : vector<3x8x128xf32>
    %c17 = arith.constant 17 : index
    %c0_54 = arith.constant 0 : index
    %c0_55 = arith.constant 0 : index
    %c0_56 = arith.constant 0 : index
    %103 = vector.load %arg2[%c17, %c0_54, %c0_55, %c0_56] : memref<30x3x1x128xf32, #tpu.memory_space<vmem>>, vector<1x3x1x128xf32>
    %104 = vector.shape_cast %103 : vector<1x3x1x128xf32> to vector<3x1x128xf32>
    %105 = vector.broadcast %104 : vector<3x1x128xf32> to vector<3x8x128xf32>
    %106 = arith.subf %1, %105 : vector<3x8x128xf32>
    %107 = math.absf %106 : vector<3x8x128xf32>
    %108 = arith.minimumf %102, %107 : vector<3x8x128xf32>
    %c18 = arith.constant 18 : index
    %c0_57 = arith.constant 0 : index
    %c0_58 = arith.constant 0 : index
    %c0_59 = arith.constant 0 : index
    %109 = vector.load %arg2[%c18, %c0_57, %c0_58, %c0_59] : memref<30x3x1x128xf32, #tpu.memory_space<vmem>>, vector<1x3x1x128xf32>
    %110 = vector.shape_cast %109 : vector<1x3x1x128xf32> to vector<3x1x128xf32>
    %111 = vector.broadcast %110 : vector<3x1x128xf32> to vector<3x8x128xf32>
    %112 = arith.subf %1, %111 : vector<3x8x128xf32>
    %113 = math.absf %112 : vector<3x8x128xf32>
    %114 = arith.minimumf %108, %113 : vector<3x8x128xf32>
    %c19 = arith.constant 19 : index
    %c0_60 = arith.constant 0 : index
    %c0_61 = arith.constant 0 : index
    %c0_62 = arith.constant 0 : index
    %115 = vector.load %arg2[%c19, %c0_60, %c0_61, %c0_62] : memref<30x3x1x128xf32, #tpu.memory_space<vmem>>, vector<1x3x1x128xf32>
    %116 = vector.shape_cast %115 : vector<1x3x1x128xf32> to vector<3x1x128xf32>
    %117 = vector.broadcast %116 : vector<3x1x128xf32> to vector<3x8x128xf32>
    %118 = arith.subf %1, %117 : vector<3x8x128xf32>
    %119 = math.absf %118 : vector<3x8x128xf32>
    %120 = arith.minimumf %114, %119 : vector<3x8x128xf32>
    %c20 = arith.constant 20 : index
    %c0_63 = arith.constant 0 : index
    %c0_64 = arith.constant 0 : index
    %c0_65 = arith.constant 0 : index
    %121 = vector.load %arg2[%c20, %c0_63, %c0_64, %c0_65] : memref<30x3x1x128xf32, #tpu.memory_space<vmem>>, vector<1x3x1x128xf32>
    %122 = vector.shape_cast %121 : vector<1x3x1x128xf32> to vector<3x1x128xf32>
    %123 = vector.broadcast %122 : vector<3x1x128xf32> to vector<3x8x128xf32>
    %124 = arith.subf %1, %123 : vector<3x8x128xf32>
    %125 = math.absf %124 : vector<3x8x128xf32>
    %126 = arith.minimumf %120, %125 : vector<3x8x128xf32>
    %c21 = arith.constant 21 : index
    %c0_66 = arith.constant 0 : index
    %c0_67 = arith.constant 0 : index
    %c0_68 = arith.constant 0 : index
    %127 = vector.load %arg2[%c21, %c0_66, %c0_67, %c0_68] : memref<30x3x1x128xf32, #tpu.memory_space<vmem>>, vector<1x3x1x128xf32>
    %128 = vector.shape_cast %127 : vector<1x3x1x128xf32> to vector<3x1x128xf32>
    %129 = vector.broadcast %128 : vector<3x1x128xf32> to vector<3x8x128xf32>
    %130 = arith.subf %1, %129 : vector<3x8x128xf32>
    %131 = math.absf %130 : vector<3x8x128xf32>
    %132 = arith.minimumf %126, %131 : vector<3x8x128xf32>
    %c22 = arith.constant 22 : index
    %c0_69 = arith.constant 0 : index
    %c0_70 = arith.constant 0 : index
    %c0_71 = arith.constant 0 : index
    %133 = vector.load %arg2[%c22, %c0_69, %c0_70, %c0_71] : memref<30x3x1x128xf32, #tpu.memory_space<vmem>>, vector<1x3x1x128xf32>
    %134 = vector.shape_cast %133 : vector<1x3x1x128xf32> to vector<3x1x128xf32>
    %135 = vector.broadcast %134 : vector<3x1x128xf32> to vector<3x8x128xf32>
    %136 = arith.subf %1, %135 : vector<3x8x128xf32>
    %137 = math.absf %136 : vector<3x8x128xf32>
    %138 = arith.minimumf %132, %137 : vector<3x8x128xf32>
    %c23 = arith.constant 23 : index
    %c0_72 = arith.constant 0 : index
    %c0_73 = arith.constant 0 : index
    %c0_74 = arith.constant 0 : index
    %139 = vector.load %arg2[%c23, %c0_72, %c0_73, %c0_74] : memref<30x3x1x128xf32, #tpu.memory_space<vmem>>, vector<1x3x1x128xf32>
    %140 = vector.shape_cast %139 : vector<1x3x1x128xf32> to vector<3x1x128xf32>
    %141 = vector.broadcast %140 : vector<3x1x128xf32> to vector<3x8x128xf32>
    %142 = arith.subf %1, %141 : vector<3x8x128xf32>
    %143 = math.absf %142 : vector<3x8x128xf32>
    %144 = arith.minimumf %138, %143 : vector<3x8x128xf32>
    %c24 = arith.constant 24 : index
    %c0_75 = arith.constant 0 : index
    %c0_76 = arith.constant 0 : index
    %c0_77 = arith.constant 0 : index
    %145 = vector.load %arg2[%c24, %c0_75, %c0_76, %c0_77] : memref<30x3x1x128xf32, #tpu.memory_space<vmem>>, vector<1x3x1x128xf32>
    %146 = vector.shape_cast %145 : vector<1x3x1x128xf32> to vector<3x1x128xf32>
    %147 = vector.broadcast %146 : vector<3x1x128xf32> to vector<3x8x128xf32>
    %148 = arith.subf %1, %147 : vector<3x8x128xf32>
    %149 = math.absf %148 : vector<3x8x128xf32>
    %150 = arith.minimumf %144, %149 : vector<3x8x128xf32>
    %c25 = arith.constant 25 : index
    %c0_78 = arith.constant 0 : index
    %c0_79 = arith.constant 0 : index
    %c0_80 = arith.constant 0 : index
    %151 = vector.load %arg2[%c25, %c0_78, %c0_79, %c0_80] : memref<30x3x1x128xf32, #tpu.memory_space<vmem>>, vector<1x3x1x128xf32>
    %152 = vector.shape_cast %151 : vector<1x3x1x128xf32> to vector<3x1x128xf32>
    %153 = vector.broadcast %152 : vector<3x1x128xf32> to vector<3x8x128xf32>
    %154 = arith.subf %1, %153 : vector<3x8x128xf32>
    %155 = math.absf %154 : vector<3x8x128xf32>
    %156 = arith.minimumf %150, %155 : vector<3x8x128xf32>
    %c26 = arith.constant 26 : index
    %c0_81 = arith.constant 0 : index
    %c0_82 = arith.constant 0 : index
    %c0_83 = arith.constant 0 : index
    %157 = vector.load %arg2[%c26, %c0_81, %c0_82, %c0_83] : memref<30x3x1x128xf32, #tpu.memory_space<vmem>>, vector<1x3x1x128xf32>
    %158 = vector.shape_cast %157 : vector<1x3x1x128xf32> to vector<3x1x128xf32>
    %159 = vector.broadcast %158 : vector<3x1x128xf32> to vector<3x8x128xf32>
    %160 = arith.subf %1, %159 : vector<3x8x128xf32>
    %161 = math.absf %160 : vector<3x8x128xf32>
    %162 = arith.minimumf %156, %161 : vector<3x8x128xf32>
    %c27 = arith.constant 27 : index
    %c0_84 = arith.constant 0 : index
    %c0_85 = arith.constant 0 : index
    %c0_86 = arith.constant 0 : index
    %163 = vector.load %arg2[%c27, %c0_84, %c0_85, %c0_86] : memref<30x3x1x128xf32, #tpu.memory_space<vmem>>, vector<1x3x1x128xf32>
    %164 = vector.shape_cast %163 : vector<1x3x1x128xf32> to vector<3x1x128xf32>
    %165 = vector.broadcast %164 : vector<3x1x128xf32> to vector<3x8x128xf32>
    %166 = arith.subf %1, %165 : vector<3x8x128xf32>
    %167 = math.absf %166 : vector<3x8x128xf32>
    %168 = arith.minimumf %162, %167 : vector<3x8x128xf32>
    %c28 = arith.constant 28 : index
    %c0_87 = arith.constant 0 : index
    %c0_88 = arith.constant 0 : index
    %c0_89 = arith.constant 0 : index
    %169 = vector.load %arg2[%c28, %c0_87, %c0_88, %c0_89] : memref<30x3x1x128xf32, #tpu.memory_space<vmem>>, vector<1x3x1x128xf32>
    %170 = vector.shape_cast %169 : vector<1x3x1x128xf32> to vector<3x1x128xf32>
    %171 = vector.broadcast %170 : vector<3x1x128xf32> to vector<3x8x128xf32>
    %172 = arith.subf %1, %171 : vector<3x8x128xf32>
    %173 = math.absf %172 : vector<3x8x128xf32>
    %174 = arith.minimumf %168, %173 : vector<3x8x128xf32>
    %c29 = arith.constant 29 : index
    %c0_90 = arith.constant 0 : index
    %c0_91 = arith.constant 0 : index
    %c0_92 = arith.constant 0 : index
    %175 = vector.load %arg2[%c29, %c0_90, %c0_91, %c0_92] : memref<30x3x1x128xf32, #tpu.memory_space<vmem>>, vector<1x3x1x128xf32>
    %176 = vector.shape_cast %175 : vector<1x3x1x128xf32> to vector<3x1x128xf32>
    %177 = vector.broadcast %176 : vector<3x1x128xf32> to vector<3x8x128xf32>
    %178 = arith.subf %1, %177 : vector<3x8x128xf32>
    %179 = math.absf %178 : vector<3x8x128xf32>
    %180 = arith.minimumf %174, %179 : vector<3x8x128xf32>
    %cst_93 = arith.constant dense<0.000000e+00> : vector<8x128xf32>
    %181 = vector.multi_reduction <add>, %180, %cst_93 [0] : vector<3x8x128xf32> to vector<8x128xf32>
    %182 = arith.addf %0, %181 : vector<8x128xf32>
    %c0_94 = arith.constant 0 : index
    %c0_95 = arith.constant 0 : index
    %183 = vector.load %arg3[%c0_94, %c0_95] : memref<8x128xf32, #tpu.memory_space<vmem>>, vector<8x128xf32>
    tpu.vector_store %arg3[%c0_94, %c0_95], %182 {strides = array<i32>} : memref<8x128xf32, #tpu.memory_space<vmem>>, vector<8x128xf32>,
    return
  }
  func.func @transform_0(%arg0: i32) -> (i32, i32, i32) {
    %c0_i32 = arith.constant 0 : i32
    %c0_i32_0 = arith.constant 0 : i32
    %c0_i32_1 = arith.constant 0 : i32
    return %c0_i32, %arg0, %c0_i32_0 : i32, i32, i32
  }
  func.func @transform_1(%arg0: i32) -> (i32, i32, i32, i32) {
    %c0_i32 = arith.constant 0 : i32
    %c0_i32_0 = arith.constant 0 : i32
    %c0_i32_1 = arith.constant 0 : i32
    %c0_i32_2 = arith.constant 0 : i32
    %c0_i32_3 = arith.constant 0 : i32
    return %c0_i32, %c0_i32_0, %c0_i32_1, %c0_i32_2 : i32, i32, i32, i32
  }
  func.func @transform_2(%arg0: i32) -> (i32, i32) {
    %c0_i32 = arith.constant 0 : i32
    %c0_i32_0 = arith.constant 0 : i32
    return %arg0, %c0_i32 : i32, i32
  }
}

</mosaic_0001>

<bundles_post_ra>
// kernel: _printability_score_impl.1
= control target key start
LH: loop header
LB: loop body
LE: loop exit
PB: predicated region body
PF: predicated region fallthrough
CT: control target
= control target key end

     0   :  { %s1518_s0 = inlined_call_operand.vmem [shape: f32[3,8,128], index: 0, kind: input, shape index: {}]   ;;  %s1519_s1 = inlined_call_operand.vmem [shape: f32[30,3,1,128], index: 1, kind: input, shape index: {}]   ;;  %s1520_s2 = inlined_call_operand.vmem [shape: f32[8,128], index: 2, kind: output, shape index: {}]  }
   0x1   :  { %v1143_v0 = vld [vmem:[%s1518_s0] sm:$0xff]  ;;  %v1148_v1 = vld [vmem:[%s1518_s0 + $0x8] sm:$0xff]  ;;  %v1153_v2 = vld [vmem:[%s1518_s0 + $0x10] sm:$0xff] }
   0x2   :  { %v948_v3 = vld [vmem:[%s1519_s1] ss:$0 sm:$0xff]  ;;  %v949_v4 = vld [vmem:[%s1519_s1 + $0x1] ss:$0 sm:$0xff]  ;;  %v950_v5 = vld [vmem:[%s1519_s1 + $0x2] ss:$0 sm:$0xff] }
   0x3   :  { %v35_v6 = vsub.f32 %v1143_v0, %v948_v3  ;;  %v36_v7 = vsub.f32 %v1148_v1, %v949_v4  ;;  %v37_v8 = vsub.f32 %v1153_v2, %v950_v5  ;;  %v954_v9 = vld [vmem:[%s1519_s1 + $0x3] ss:$0 sm:$0xff]  ;;  %v955_v10 = vld [vmem:[%s1519_s1 + $0x4] ss:$0 sm:$0xff]  ;;  %v956_v11 = vld [vmem:[%s1519_s1 + $0x5] ss:$0 sm:$0xff] }
   0x4   :  { %v63_v12 = vsub.f32 %v1143_v0, %v954_v9  ;;  %v64_v13 = vsub.f32 %v1148_v1, %v955_v10  ;;  %v65_v14 = vsub.f32 %v1153_v2, %v956_v11  ;;  %v960_v15 = vld [vmem:[%s1519_s1 + $0x6] ss:$0 sm:$0xff]  ;;  %v961_v16 = vld [vmem:[%s1519_s1 + $0x7] ss:$0 sm:$0xff]  ;;  %v962_v17 = vld [vmem:[%s1519_s1 + $0x8] ss:$0 sm:$0xff] }
   0x5   :  { %v38_v18 = vand.u32 2147483647, %v35_v6  ;;  %v39_v19 = vand.u32 2147483647, %v36_v7  ;;  %v40_v20 = vand.u32 2147483647, %v37_v8  ;;  %v94_v21 = vsub.f32 %v1143_v0, %v960_v15 }
   0x6   :  { %v66_v22 = vand.u32 2147483647, %v63_v12  ;;  %v67_v23 = vand.u32 2147483647, %v64_v13  ;;  %v68_v24 = vand.u32 2147483647, %v65_v14  ;;  %v95_v25 = vsub.f32 %v1148_v1, %v961_v16 }
   0x7   :  { %v96_v26 = vsub.f32 %v1153_v2, %v962_v17  ;;  %v97_v27 = vand.u32 2147483647, %v94_v21  ;;  %v966_v28 = vld [vmem:[%s1519_s1 + $0x9] ss:$0 sm:$0xff]  ;;  %v967_v29 = vld [vmem:[%s1519_s1 + $0xa] ss:$0 sm:$0xff] }
   0x8   :  { %v69_v30 = vmin.f32 %v38_v18, %v66_v22  ;;  %v70_v31 = vmin.f32 %v39_v19, %v67_v23  ;;  %v71_v32 = vmin.f32 %v40_v20, %v68_v24  ;;  %v98_v33 = vand.u32 2147483647, %v95_v25  ;;  %v968_v34 = vld [vmem:[%s1519_s1 + $0xb] ss:$0 sm:$0xff]  ;;  %v972_v35 = vld [vmem:[%s1519_s1 + $0xc] ss:$0 sm:$0xff] }
   0x9   :  { %v99_v36 = vand.u32 2147483647, %v96_v26  ;;  %v125_v37 = vsub.f32 %v1143_v0, %v966_v28  ;;  %v126_v38 = vsub.f32 %v1148_v1, %v967_v29  ;;  %v127_v39 = vsub.f32 %v1153_v2, %v968_v34  ;;  %v973_v40 = vld [vmem:[%s1519_s1 + $0xd] ss:$0 sm:$0xff]  ;;  %v974_v41 = vld [vmem:[%s1519_s1 + $0xe] ss:$0 sm:$0xff] }
   0xa   :  { %v100_v42 = vmin.f32 %v69_v30, %v97_v27  ;;  %v101_v43 = vmin.f32 %v70_v31, %v98_v33  ;;  %v156_v44 = vsub.f32 %v1143_v0, %v972_v35  ;;  %v157_v45 = vsub.f32 %v1148_v1, %v973_v40  ;;  %v978_v46 = vld [vmem:[%s1519_s1 + $0xf] ss:$0 sm:$0xff]  ;;  %v979_v47 = vld [vmem:[%s1519_s1 + $0x10] ss:$0 sm:$0xff]  ;;  %v980_v48 = vld [vmem:[%s1519_s1 + $0x11] ss:$0 sm:$0xff] }
   0xb   :  { %v102_v49 = vmin.f32 %v71_v32, %v99_v36  ;;  %v128_v50 = vand.u32 2147483647, %v125_v37  ;;  %v129_v51 = vand.u32 2147483647, %v126_v38  ;;  %v130_v52 = vand.u32 2147483647, %v127_v39 }
   0xc   :  { %v158_v53 = vsub.f32 %v1153_v2, %v974_v41  ;;  %v159_v54 = vand.u32 2147483647, %v156_v44  ;;  %v160_v55 = vand.u32 2147483647, %v157_v45  ;;  %v187_v56 = vsub.f32 %v1143_v0, %v978_v46  ;;  %v984_v57 = vld [vmem:[%s1519_s1 + $0x12] ss:$0 sm:$0xff] }
   0xd   :  { %v131_v58 = vmin.f32 %v100_v42, %v128_v50  ;;  %v132_v59 = vmin.f32 %v101_v43, %v129_v51  ;;  %v133_v60 = vmin.f32 %v102_v49, %v130_v52  ;;  %v188_v61 = vsub.f32 %v1148_v1, %v979_v47  ;;  %v985_v62 = vld [vmem:[%s1519_s1 + $0x13] ss:$0 sm:$0xff]  ;;  %v986_v63 = vld [vmem:[%s1519_s1 + $0x14] ss:$0 sm:$0xff]  ;;  %v990_v7 = vld [vmem:[%s1519_s1 + $0x15] ss:$0 sm:$0xff] }
   0xe   :  { %v161_v3 = vand.u32 2147483647, %v158_v53  ;;  %v189_v4 = vsub.f32 %v1153_v2, %v980_v48  ;;  %v190_v5 = vand.u32 2147483647, %v187_v56  ;;  %v218_v6 = vsub.f32 %v1143_v0, %v984_v57  ;;  %v991_v12 = vld [vmem:[%s1519_s1 + $0x16] ss:$0 sm:$0xff] }
   0xf   :  { %v162_v8 = vmin.f32 %v131_v58, %v159_v54  ;;  %v163_v9 = vmin.f32 %v132_v59, %v160_v55  ;;  %v191_v10 = vand.u32 2147483647, %v188_v61  ;;  %v219_v11 = vsub.f32 %v1148_v1, %v985_v62  ;;  %v992_v13 = vld [vmem:[%s1519_s1 + $0x17] ss:$0 sm:$0xff]  ;;  %v996_v18 = vld [vmem:[%s1519_s1 + $0x18] ss:$0 sm:$0xff] }
  0x10   :  { %v164_v14 = vmin.f32 %v133_v60, %v161_v3  ;;  %v192_v15 = vand.u32 2147483647, %v189_v4  ;;  %v220_v16 = vsub.f32 %v1153_v2, %v986_v63  ;;  %v221_v17 = vand.u32 2147483647, %v218_v6  ;;  %v997_v23 = vld [vmem:[%s1519_s1 + $0x19] ss:$0 sm:$0xff] }
  0x11   :  { %v193_v19 = vmin.f32 %v162_v8, %v190_v5  ;;  %v194_v20 = vmin.f32 %v163_v9, %v191_v10  ;;  %v222_v21 = vand.u32 2147483647, %v219_v11  ;;  %v249_v22 = vsub.f32 %v1143_v0, %v990_v7  ;;  %v998_v28 = vld [vmem:[%s1519_s1 + $0x1a] ss:$0 sm:$0xff]  ;;  %v1002_v29 = vld [vmem:[%s1519_s1 + $0x1b] ss:$0 sm:$0xff] }
  0x12   :  { %v195_v24 = vmin.f32 %v164_v14, %v192_v15  ;;  %v223_v25 = vand.u32 2147483647, %v220_v16  ;;  %v250_v26 = vsub.f32 %v1148_v1, %v991_v12  ;;  %v251_v27 = vsub.f32 %v1153_v2, %v992_v13  ;;  %v1003_v34 = vld [vmem:[%s1519_s1 + $0x1c] ss:$0 sm:$0xff]  ;;  %v1004_v39 = vld [vmem:[%s1519_s1 + $0x1d] ss:$0 sm:$0xff] }
  0x13   :  { %v224_v30 = vmin.f32 %v193_v19, %v221_v17  ;;  %v225_v31 = vmin.f32 %v194_v20, %v222_v21  ;;  %v252_v32 = vand.u32 2147483647, %v249_v22  ;;  %v280_v33 = vsub.f32 %v1143_v0, %v996_v18  ;;  %v1008_v44 = vld [vmem:[%s1519_s1 + $0x1e] ss:$0 sm:$0xff]  ;;  %v1009_v45 = vld [vmem:[%s1519_s1 + $0x1f] ss:$0 sm:$0xff] }
  0x14   :  { %v226_v35 = vmin.f32 %v195_v24, %v223_v25  ;;  %v253_v36 = vand.u32 2147483647, %v250_v26  ;;  %v254_v37 = vand.u32 2147483647, %v251_v27  ;;  %v281_v38 = vsub.f32 %v1148_v1, %v997_v23  ;;  %v1010_v50 = vld [vmem:[%s1519_s1 + $0x20] ss:$0 sm:$0xff] }
  0x15   :  { %v255_v40 = vmin.f32 %v224_v30, %v252_v32  ;;  %v282_v41 = vsub.f32 %v1153_v2, %v998_v28  ;;  %v283_v42 = vand.u32 2147483647, %v280_v33  ;;  %v311_v43 = vsub.f32 %v1143_v0, %v1002_v29  ;;  %v1014_v55 = vld [vmem:[%s1519_s1 + $0x21] ss:$0 sm:$0xff]  ;;  %v1015_v60 = vld [vmem:[%s1519_s1 + $0x22] ss:$0 sm:$0xff] }
  0x16   :  { %v256_v46 = vmin.f32 %v225_v31, %v253_v36  ;;  %v257_v47 = vmin.f32 %v226_v35, %v254_v37  ;;  %v284_v48 = vand.u32 2147483647, %v281_v38  ;;  %v312_v49 = vsub.f32 %v1148_v1, %v1003_v34  ;;  %v1016_v61 = vld [vmem:[%s1519_s1 + $0x23] ss:$0 sm:$0xff]  ;;  %v1020_v5 = vld [vmem:[%s1519_s1 + $0x24] ss:$0 sm:$0xff] }
  0x17   :  { %v285_v51 = vand.u32 2147483647, %v282_v41  ;;  %v286_v52 = vmin.f32 %v255_v40, %v283_v42  ;;  %v313_v53 = vsub.f32 %v1153_v2, %v1004_v39  ;;  %v314_v54 = vand.u32 2147483647, %v311_v43  ;;  %v1021_v10 = vld [vmem:[%s1519_s1 + $0x25] ss:$0 sm:$0xff] }
  0x18   :  { %v287_v56 = vmin.f32 %v256_v46, %v284_v48  ;;  %v315_v57 = vand.u32 2147483647, %v312_v49  ;;  %v342_v58 = vsub.f32 %v1143_v0, %v1008_v44  ;;  %v343_v59 = vsub.f32 %v1148_v1, %v1009_v45  ;;  %v1022_v15 = vld [vmem:[%s1519_s1 + $0x26] ss:$0 sm:$0xff]  ;;  %v1026_v16 = vld [vmem:[%s1519_s1 + $0x27] ss:$0 sm:$0xff] }
  0x19   :  { %v288_v62 = vmin.f32 %v257_v47, %v285_v51  ;;  %v316_v63 = vand.u32 2147483647, %v313_v53  ;;  %v317_v3 = vmin.f32 %v286_v52, %v314_v54  ;;  %v344_v4 = vsub.f32 %v1153_v2, %v1010_v50  ;;  %v1027_v21 = vld [vmem:[%s1519_s1 + $0x28] ss:$0 sm:$0xff]  ;;  %v1028_v26 = vld [vmem:[%s1519_s1 + $0x29] ss:$0 sm:$0xff] }
  0x1a   :  { %v318_v6 = vmin.f32 %v287_v56, %v315_v57  ;;  %v345_v7 = vand.u32 2147483647, %v342_v58  ;;  %v346_v8 = vand.u32 2147483647, %v343_v59  ;;  %v373_v9 = vsub.f32 %v1143_v0, %v1014_v55  ;;  %v1032_v31 = vld [vmem:[%s1519_s1 + $0x2a] ss:$0 sm:$0xff] }
  0x1b   :  { %v319_v11 = vmin.f32 %v288_v62, %v316_v63  ;;  %v347_v12 = vand.u32 2147483647, %v344_v4  ;;  %v374_v13 = vsub.f32 %v1148_v1, %v1015_v60  ;;  %v375_v14 = vsub.f32 %v1153_v2, %v1016_v61  ;;  %v1033_v32 = vld [vmem:[%s1519_s1 + $0x2b] ss:$0 sm:$0xff]  ;;  %v1034_v37 = vld [vmem:[%s1519_s1 + $0x2c] ss:$0 sm:$0xff] }
  0x1c   :  { %v348_v17 = vmin.f32 %v317_v3, %v345_v7  ;;  %v349_v18 = vmin.f32 %v318_v6, %v346_v8  ;;  %v376_v19 = vand.u32 2147483647, %v373_v9  ;;  %v404_v20 = vsub.f32 %v1143_v0, %v1020_v5  ;;  %v1038_v42 = vld [vmem:[%s1519_s1 + $0x2d] ss:$0 sm:$0xff]  ;;  %v1039_v47 = vld [vmem:[%s1519_s1 + $0x2e] ss:$0 sm:$0xff] }
  0x1d   :  { %v350_v22 = vmin.f32 %v319_v11, %v347_v12  ;;  %v377_v23 = vand.u32 2147483647, %v374_v13  ;;  %v378_v24 = vand.u32 2147483647, %v375_v14  ;;  %v405_v25 = vsub.f32 %v1148_v1, %v1021_v10  ;;  %v1040_v48 = vld [vmem:[%s1519_s1 + $0x2f] ss:$0 sm:$0xff] }
  0x1e   :  { %v379_v27 = vmin.f32 %v348_v17, %v376_v19  ;;  %v406_v28 = vsub.f32 %v1153_v2, %v1022_v15  ;;  %v407_v29 = vand.u32 2147483647, %v404_v20  ;;  %v435_v30 = vsub.f32 %v1143_v0, %v1026_v16  ;;  %v1044_v53 = vld [vmem:[%s1519_s1 + $0x30] ss:$0 sm:$0xff]  ;;  %v1045_v58 = vld [vmem:[%s1519_s1 + $0x31] ss:$0 sm:$0xff] }
  0x1f   :  { %v380_v33 = vmin.f32 %v349_v18, %v377_v23  ;;  %v381_v34 = vmin.f32 %v350_v22, %v378_v24  ;;  %v408_v35 = vand.u32 2147483647, %v405_v25  ;;  %v436_v36 = vsub.f32 %v1148_v1, %v1027_v21  ;;  %v1046_v63 = vld [vmem:[%s1519_s1 + $0x32] ss:$0 sm:$0xff]  ;;  %v1050_v3 = vld [vmem:[%s1519_s1 + $0x33] ss:$0 sm:$0xff] }
  0x20   :  { %v409_v38 = vand.u32 2147483647, %v406_v28  ;;  %v410_v39 = vmin.f32 %v379_v27, %v407_v29  ;;  %v437_v40 = vsub.f32 %v1153_v2, %v1028_v26  ;;  %v438_v41 = vand.u32 2147483647, %v435_v30  ;;  %v1051_v8 = vld [vmem:[%s1519_s1 + $0x34] ss:$0 sm:$0xff] }
  0x21   :  { %v411_v43 = vmin.f32 %v380_v33, %v408_v35  ;;  %v439_v44 = vand.u32 2147483647, %v436_v36  ;;  %v466_v45 = vsub.f32 %v1143_v0, %v1032_v31  ;;  %v467_v46 = vsub.f32 %v1148_v1, %v1033_v32  ;;  %v1052_v13 = vld [vmem:[%s1519_s1 + $0x35] ss:$0 sm:$0xff]  ;;  %v1056_v18 = vld [vmem:[%s1519_s1 + $0x36] ss:$0 sm:$0xff] }
  0x22   :  { %v412_v49 = vmin.f32 %v381_v34, %v409_v38  ;;  %v440_v50 = vand.u32 2147483647, %v437_v40  ;;  %v441_v51 = vmin.f32 %v410_v39, %v438_v41  ;;  %v468_v52 = vsub.f32 %v1153_v2, %v1034_v37  ;;  %v1057_v19 = vld [vmem:[%s1519_s1 + $0x37] ss:$0 sm:$0xff]  ;;  %v1058_v24 = vld [vmem:[%s1519_s1 + $0x38] ss:$0 sm:$0xff] }
  0x23   :  { %v442_v54 = vmin.f32 %v411_v43, %v439_v44  ;;  %v469_v55 = vand.u32 2147483647, %v466_v45  ;;  %v470_v56 = vand.u32 2147483647, %v467_v46  ;;  %v497_v57 = vsub.f32 %v1143_v0, %v1038_v42  ;;  %v1062_v29 = vld [vmem:[%s1519_s1 + $0x39] ss:$0 sm:$0xff] }
  0x24   :  { %v443_v59 = vmin.f32 %v412_v49, %v440_v50  ;;  %v471_v60 = vand.u32 2147483647, %v468_v52  ;;  %v498_v61 = vsub.f32 %v1148_v1, %v1039_v47  ;;  %v499_v62 = vsub.f32 %v1153_v2, %v1040_v48  ;;  %v1063_v34 = vld [vmem:[%s1519_s1 + $0x3a] ss:$0 sm:$0xff]  ;;  %v1064_v35 = vld [vmem:[%s1519_s1 + $0x3b] ss:$0 sm:$0xff] }
  0x25   :  { %v472_v4 = vmin.f32 %v441_v51, %v469_v55  ;;  %v473_v5 = vmin.f32 %v442_v54, %v470_v56  ;;  %v500_v6 = vand.u32 2147483647, %v497_v57  ;;  %v528_v7 = vsub.f32 %v1143_v0, %v1044_v53  ;;  %v1068_v40 = vld [vmem:[%s1519_s1 + $0x3c] ss:$0 sm:$0xff]  ;;  %v1069_v45 = vld [vmem:[%s1519_s1 + $0x3d] ss:$0 sm:$0xff] }
  0x26   :  { %v474_v9 = vmin.f32 %v443_v59, %v471_v60  ;;  %v501_v10 = vand.u32 2147483647, %v498_v61  ;;  %v502_v11 = vand.u32 2147483647, %v499_v62  ;;  %v529_v12 = vsub.f32 %v1148_v1, %v1045_v58  ;;  %v1070_v50 = vld [vmem:[%s1519_s1 + $0x3e] ss:$0 sm:$0xff] }
  0x27   :  { %v503_v14 = vmin.f32 %v472_v4, %v500_v6  ;;  %v530_v15 = vsub.f32 %v1153_v2, %v1046_v63  ;;  %v531_v16 = vand.u32 2147483647, %v528_v7  ;;  %v559_v17 = vsub.f32 %v1143_v0, %v1050_v3  ;;  %v1074_v51 = vld [vmem:[%s1519_s1 + $0x3f] ss:$0 sm:$0xff]  ;;  %v1075_v56 = vld [vmem:[%s1519_s1 + $0x40] ss:$0 sm:$0xff] }
  0x28   :  { %v504_v20 = vmin.f32 %v473_v5, %v501_v10  ;;  %v505_v21 = vmin.f32 %v474_v9, %v502_v11  ;;  %v532_v22 = vand.u32 2147483647, %v529_v12  ;;  %v560_v23 = vsub.f32 %v1148_v1, %v1051_v8  ;;  %v1076_v61 = vld [vmem:[%s1519_s1 + $0x41] ss:$0 sm:$0xff]  ;;  %v1080_v5 = vld [vmem:[%s1519_s1 + $0x42] ss:$0 sm:$0xff] }
  0x29   :  { %v533_v25 = vand.u32 2147483647, %v530_v15  ;;  %v534_v26 = vmin.f32 %v503_v14, %v531_v16  ;;  %v561_v27 = vsub.f32 %v1153_v2, %v1052_v13  ;;  %v562_v28 = vand.u32 2147483647, %v559_v17  ;;  %v1081_v6 = vld [vmem:[%s1519_s1 + $0x43] ss:$0 sm:$0xff] }
  0x2a   :  { %v535_v30 = vmin.f32 %v504_v20, %v532_v22  ;;  %v563_v31 = vand.u32 2147483647, %v560_v23  ;;  %v590_v32 = vsub.f32 %v1143_v0, %v1056_v18  ;;  %v591_v33 = vsub.f32 %v1148_v1, %v1057_v19  ;;  %v1082_v11 = vld [vmem:[%s1519_s1 + $0x44] ss:$0 sm:$0xff]  ;;  %v1086_v16 = vld [vmem:[%s1519_s1 + $0x45] ss:$0 sm:$0xff] }
  0x2b   :  { %v536_v36 = vmin.f32 %v505_v21, %v533_v25  ;;  %v564_v37 = vand.u32 2147483647, %v561_v27  ;;  %v565_v38 = vmin.f32 %v534_v26, %v562_v28  ;;  %v592_v39 = vsub.f32 %v1153_v2, %v1058_v24  ;;  %v1087_v21 = vld [vmem:[%s1519_s1 + $0x46] ss:$0 sm:$0xff]  ;;  %v1088_v22 = vld [vmem:[%s1519_s1 + $0x47] ss:$0 sm:$0xff] }
  0x2c   :  { %v566_v41 = vmin.f32 %v535_v30, %v563_v31  ;;  %v593_v42 = vand.u32 2147483647, %v590_v32  ;;  %v594_v43 = vand.u32 2147483647, %v591_v33  ;;  %v621_v44 = vsub.f32 %v1143_v0, %v1062_v29  ;;  %v1092_v27 = vld [vmem:[%s1519_s1 + $0x48] ss:$0 sm:$0xff] }
  0x2d   :  { %v567_v46 = vmin.f32 %v536_v36, %v564_v37  ;;  %v595_v47 = vand.u32 2147483647, %v592_v39  ;;  %v622_v48 = vsub.f32 %v1148_v1, %v1063_v34  ;;  %v623_v49 = vsub.f32 %v1153_v2, %v1064_v35  ;;  %v1093_v32 = vld [vmem:[%s1519_s1 + $0x49] ss:$0 sm:$0xff]  ;;  %v1094_v37 = vld [vmem:[%s1519_s1 + $0x4a] ss:$0 sm:$0xff] }
  0x2e   :  { %v596_v52 = vmin.f32 %v565_v38, %v593_v42  ;;  %v597_v53 = vmin.f32 %v566_v41, %v594_v43  ;;  %v624_v54 = vand.u32 2147483647, %v621_v44  ;;  %v652_v55 = vsub.f32 %v1143_v0, %v1068_v40  ;;  %v1098_v38 = vld [vmem:[%s1519_s1 + $0x4b] ss:$0 sm:$0xff]  ;;  %v1099_v43 = vld [vmem:[%s1519_s1 + $0x4c] ss:$0 sm:$0xff] }
  0x2f   :  { %v598_v57 = vmin.f32 %v567_v46, %v595_v47  ;;  %v625_v58 = vand.u32 2147483647, %v622_v48  ;;  %v626_v59 = vand.u32 2147483647, %v623_v49  ;;  %v653_v60 = vsub.f32 %v1148_v1, %v1069_v45  ;;  %v1100_v48 = vld [vmem:[%s1519_s1 + $0x4d] ss:$0 sm:$0xff] }
  0x30   :  { %v627_v62 = vmin.f32 %v596_v52, %v624_v54  ;;  %v654_v63 = vsub.f32 %v1153_v2, %v1070_v50  ;;  %v655_v3 = vand.u32 2147483647, %v652_v55  ;;  %v683_v4 = vsub.f32 %v1143_v0, %v1074_v51  ;;  %v1105_v54 = vld [vmem:[%s1519_s1 + $0x4f] ss:$0 sm:$0xff] }
  0x31   :  { %v628_v7 = vmin.f32 %v597_v53, %v625_v58  ;;  %v629_v8 = vmin.f32 %v598_v57, %v626_v59  ;;  %v656_v9 = vand.u32 2147483647, %v653_v60  ;;  %v684_v10 = vsub.f32 %v1148_v1, %v1075_v56  ;;  %v1104_v53 = vld [vmem:[%s1519_s1 + $0x4e] ss:$0 sm:$0xff]  ;;  %v1106_v59 = vld [vmem:[%s1519_s1 + $0x50] ss:$0 sm:$0xff] }
  0x32   :  { %v657_v12 = vand.u32 2147483647, %v654_v63  ;;  %v658_v13 = vmin.f32 %v627_v62, %v655_v3  ;;  %v685_v14 = vsub.f32 %v1153_v2, %v1076_v61  ;;  %v686_v15 = vand.u32 2147483647, %v683_v4  ;;  %v1110_v3 = vld [vmem:[%s1519_s1 + $0x51] ss:$0 sm:$0xff] }
  0x33   :  { %v659_v17 = vmin.f32 %v628_v7, %v656_v9  ;;  %v687_v18 = vand.u32 2147483647, %v684_v10  ;;  %v714_v19 = vsub.f32 %v1143_v0, %v1080_v5  ;;  %v715_v20 = vsub.f32 %v1148_v1, %v1081_v6  ;;  %v1112_v9 = vld [vmem:[%s1519_s1 + $0x53] ss:$0 sm:$0xff] }
  0x34   :  { %v660_v23 = vmin.f32 %v629_v8, %v657_v12  ;;  %v688_v24 = vand.u32 2147483647, %v685_v14  ;;  %v689_v25 = vmin.f32 %v658_v13, %v686_v15  ;;  %v716_v26 = vsub.f32 %v1153_v2, %v1082_v11  ;;  %v1111_v8 = vld [vmem:[%s1519_s1 + $0x52] ss:$0 sm:$0xff]  ;;  %v1116_v14 = vld [vmem:[%s1519_s1 + $0x54] ss:$0 sm:$0xff] }
  0x35   :  { %v690_v28 = vmin.f32 %v659_v17, %v687_v18  ;;  %v717_v29 = vand.u32 2147483647, %v714_v19  ;;  %v718_v30 = vand.u32 2147483647, %v715_v20  ;;  %v745_v31 = vsub.f32 %v1143_v0, %v1086_v16  ;;  %v1117_v19 = vld [vmem:[%s1519_s1 + $0x55] ss:$0 sm:$0xff] }
  0x36   :  { %v691_v33 = vmin.f32 %v660_v23, %v688_v24  ;;  %v719_v34 = vand.u32 2147483647, %v716_v26  ;;  %v746_v35 = vsub.f32 %v1148_v1, %v1087_v21  ;;  %v747_v36 = vsub.f32 %v1153_v2, %v1088_v22  ;;  %v1118_v24 = vld [vmem:[%s1519_s1 + $0x56] ss:$0 sm:$0xff] }
  0x37   :  { %v720_v39 = vmin.f32 %v689_v25, %v717_v29  ;;  %v721_v40 = vmin.f32 %v690_v28, %v718_v30  ;;  %v748_v41 = vand.u32 2147483647, %v745_v31  ;;  %v776_v42 = vsub.f32 %v1143_v0, %v1092_v27  ;;  %v1122_v25 = vld [vmem:[%s1519_s1 + $0x57] ss:$0 sm:$0xff]  ;;  %v1123_v30 = vld [vmem:[%s1519_s1 + $0x58] ss:$0 sm:$0xff] }
  0x38   :  { %v722_v44 = vmin.f32 %v691_v33, %v719_v34  ;;  %v749_v45 = vand.u32 2147483647, %v746_v35  ;;  %v750_v46 = vand.u32 2147483647, %v747_v36  ;;  %v777_v47 = vsub.f32 %v1148_v1, %v1093_v32  ;;  %v1124_v35 = vld [vmem:[%s1519_s1 + $0x59] ss:$0 sm:$0xff] }
  0x39   :  { %v751_v49 = vmin.f32 %v720_v39, %v748_v41  ;;  %v778_v50 = vsub.f32 %v1153_v2, %v1094_v37  ;;  %v779_v51 = vand.u32 2147483647, %v776_v42  ;;  %v807_v52 = vsub.f32 %v1143_v0, %v1098_v38 }
  0x3a   :  { %v752_v55 = vmin.f32 %v721_v40, %v749_v45  ;;  %v753_v56 = vmin.f32 %v722_v44, %v750_v46  ;;  %v780_v57 = vand.u32 2147483647, %v777_v47  ;;  %v808_v58 = vsub.f32 %v1148_v1, %v1099_v43 }
  0x3b   :  { %v781_v60 = vand.u32 2147483647, %v778_v50  ;;  %v782_v61 = vmin.f32 %v751_v49, %v779_v51  ;;  %v809_v62 = vsub.f32 %v1153_v2, %v1100_v48  ;;  %v810_v63 = vand.u32 2147483647, %v807_v52 }
  0x3c   :  { %v783_v4 = vmin.f32 %v752_v55, %v780_v57  ;;  %v811_v5 = vand.u32 2147483647, %v808_v58  ;;  %v838_v6 = vsub.f32 %v1143_v0, %v1104_v53  ;;  %v839_v7 = vsub.f32 %v1148_v1, %v1105_v54 }
  0x3d   :  { %v784_v10 = vmin.f32 %v753_v56, %v781_v60  ;;  %v812_v11 = vand.u32 2147483647, %v809_v62  ;;  %v813_v12 = vmin.f32 %v782_v61, %v810_v63  ;;  %v840_v13 = vsub.f32 %v1153_v2, %v1106_v59 }
  0x3e   :  { %v814_v15 = vmin.f32 %v783_v4, %v811_v5  ;;  %v841_v16 = vand.u32 2147483647, %v838_v6  ;;  %v842_v17 = vand.u32 2147483647, %v839_v7  ;;  %v869_v18 = vsub.f32 %v1143_v0, %v1110_v3 }
  0x3f   :  { %v815_v20 = vmin.f32 %v784_v10, %v812_v11  ;;  %v843_v21 = vand.u32 2147483647, %v840_v13  ;;  %v870_v22 = vsub.f32 %v1148_v1, %v1111_v8  ;;  %v871_v23 = vsub.f32 %v1153_v2, %v1112_v9 }
  0x40   :  { %v844_v26 = vmin.f32 %v813_v12, %v841_v16  ;;  %v845_v27 = vmin.f32 %v814_v15, %v842_v17  ;;  %v872_v28 = vand.u32 2147483647, %v869_v18  ;;  %v900_v29 = vsub.f32 %v1143_v0, %v1116_v14 }
  0x41   :  { %v846_v31 = vmin.f32 %v815_v20, %v843_v21  ;;  %v873_v32 = vand.u32 2147483647, %v870_v22  ;;  %v874_v33 = vand.u32 2147483647, %v871_v23  ;;  %v901_v34 = vsub.f32 %v1148_v1, %v1117_v19 }
  0x42   :  { %v875_v36 = vmin.f32 %v844_v26, %v872_v28  ;;  %v902_v37 = vsub.f32 %v1153_v2, %v1118_v24  ;;  %v903_v38 = vand.u32 2147483647, %v900_v29  ;;  %v931_v39 = vsub.f32 %v1143_v0, %v1122_v25 }
  0x43   :  { %v876_v40 = vmin.f32 %v845_v27, %v873_v32  ;;  %v877_v41 = vmin.f32 %v846_v31, %v874_v33  ;;  %v904_v42 = vand.u32 2147483647, %v901_v34  ;;  %v932_v43 = vsub.f32 %v1148_v1, %v1123_v30 }
  0x44   :  { %v905_v44 = vand.u32 2147483647, %v902_v37  ;;  %v906_v45 = vmin.f32 %v875_v36, %v903_v38  ;;  %v933_v46 = vsub.f32 %v1153_v2, %v1124_v35  ;;  %v934_v47 = vand.u32 2147483647, %v931_v39 }
  0x45   :  { %v907_v48 = vmin.f32 %v876_v40, %v904_v42  ;;  %v935_v49 = vand.u32 2147483647, %v932_v43 }
  0x46   :  { %v908_v50 = vmin.f32 %v877_v41, %v905_v44  ;;  %v936_v51 = vand.u32 2147483647, %v933_v46  ;;  %v937_v52 = vmin.f32 %v906_v45, %v934_v47 }
  0x47   :  { %v938_v53 = vmin.f32 %v907_v48, %v935_v49 }
  0x48   :  { %v939_v54 = vmin.f32 %v908_v50, %v936_v51 }
  0x49   :  { %v940_v55 = vadd.f32 %v938_v53, %v937_v52 }
  0x4b   :  { %v941_v56 = vadd.f32 %v940_v55, %v939_v54 }
  0x4d   :  { %943 = vst [vmem:[%s1520_s2] sm:$0xff] %v941_v56 }

</bundles_post_ra>
